<compile_context>
chip_gen: v5e
topology: v5e:2x2
jax: 0.10.0
libtpu: 0.0.40
codegen_flags: <defaults>
</compile_context>

<pallas_src>
import math

import jax
import jax.numpy as jnp
from jax import lax
from jax.experimental import pallas as pl
from jax.experimental.pallas import tpu as pltpu


def _lmhead_kernel(x_ref, wd_ref, bd_ref, lnw_ref, lnb_ref, wdec_ref, bias_ref,
                   o_ref, acc_ref):
    """One (row-tile i, k-tile k) grid step of the fused LM head."""
    k = pl.program_id(1)
    nk = pl.num_programs(1)

    @pl.when(k == 0)
    def _():
        acc_ref[...] = jnp.zeros_like(acc_ref)

    # dense: accumulate x[:, k-slice] @ Wd^T[k-slice, :] (bf16 MXU, f32 acc).
    acc_ref[...] += jnp.dot(
        x_ref[...].astype(jnp.bfloat16), wd_ref[...],
        preferred_element_type=jnp.float32)

    @pl.when(k == nk - 1)
    def _():
        h = acc_ref[...] + bd_ref[...]                            # (TM, H) f32

        # ESM gelu: x * 0.5 * (1 + erf(x / sqrt(2)))  (erf -> EUP slot)
        h = h * 0.5 * (1.0 + lax.erf(h * (1.0 / math.sqrt(2.0))))

        # LayerNorm over hidden dim, eps=1e-5 (f32 math; rsqrt -> EUP).
        mean = jnp.mean(h, axis=-1, keepdims=True)
        cent = h - mean
        var = jnp.mean(cent * cent, axis=-1, keepdims=True)
        h = cent * lax.rsqrt(var + 1e-5)
        h = h * lnw_ref[...] + lnb_ref[...]

        # decoder (no bias) + separate bias parameter; V lane-padded to a
        # multiple of 128 in the wrapper so this store is unmasked/lane-dense.
        out = jnp.dot(h.astype(jnp.bfloat16), wdec_ref[...],
                      preferred_element_type=jnp.float32)
        o_ref[...] = (out + bias_ref[...]).astype(o_ref.dtype)


def _round_up(x, m):
    return (x + m - 1) // m * m


def lm_head(features, params, *, block_m=256, block_k=512):
    """features: (B, S, H) float32 -> logits (B, S, V) float32."""
    B, S, H = features.shape
    V = params["bias"].shape[0]
    Vp = _round_up(V, 128)                    # lane-dense logits slab

    x = features.reshape(B * S, H)            # collapse leading dims (no copy)
    M = x.shape[0]

    # Row-tile: big enough to feed the MXU, no bigger than the (8-aligned)
    # problem, and keep >= 2 M-grid steps so both v7x cores get row-tiles.
    bm = min(block_m, _round_up(M, 8))
    while bm >= 256 and pl.cdiv(M, bm) < 2:
        bm //= 2

    # K-tile for the dense contraction (bounds the resident weight slab).
    bk = min(block_k, H)
    if H % bk != 0:
        bk = H

    num_m = pl.cdiv(M, bm)
    num_k = H // bk

    # Weights pre-transposed; matmul operands bf16 (f32 accumulation in-kernel).
    wd_t = params["dense_w"].T.astype(jnp.bfloat16)                 # (H, H)
    wdec_t = jnp.pad(params["decoder_w"].T.astype(jnp.bfloat16),
                     ((0, 0), (0, Vp - V)))                         # (H, Vp)
    bd = params["dense_b"][None, :].astype(jnp.float32)             # (1, H)
    lnw = params["ln_w"][None, :].astype(jnp.float32)               # (1, H)
    lnb = params["ln_b"][None, :].astype(jnp.float32)               # (1, H)
    bias = jnp.pad(params["bias"].astype(jnp.float32),
                   (0, Vp - V))[None, :]                            # (1, Vp)

    cost = pl.CostEstimate(
        flops=2 * M * H * H + 2 * M * H * Vp,
        transcendentals=M * H,                                      # erf
        bytes_accessed=(M * H * 4 + H * H * 2 + H * Vp * 2
                        + (3 * H + Vp) * 4 + M * Vp * 4))

    # VMEM budget: double-buffered streaming/invariant tiles + f32 accumulator;
    # cap well below the smallest (v7x, 64 MiB) physical VMEM.
    vmem_est = (2 * bm * bk * 4 + 2 * bk * H * 2            # x, Wd tiles
                + 2 * H * Vp * 2 + 2 * (3 * H + Vp) * 4     # invariants
                + bm * H * 4 + 2 * bm * Vp * 4)             # acc + out
    vmem_limit = int(min(max(2 * vmem_est, 32 * 1024 * 1024),
                         48 * 1024 * 1024))

    grid_spec = pltpu.PrefetchScalarGridSpec(
        num_scalar_prefetch=0,
        grid=(num_m, num_k),
        in_specs=[
            pl.BlockSpec((bm, bk), lambda i, k: (i, k)),        # x tile
            pl.BlockSpec((bk, H), lambda i, k: (k, 0)),         # dense W^T
            pl.BlockSpec((1, H), lambda i, k: (0, 0)),          # dense b
            pl.BlockSpec((1, H), lambda i, k: (0, 0)),          # ln weight
            pl.BlockSpec((1, H), lambda i, k: (0, 0)),          # ln bias
            pl.BlockSpec((H, Vp), lambda i, k: (0, 0)),         # decoder W^T
            pl.BlockSpec((1, Vp), lambda i, k: (0, 0)),         # lm bias
        ],
        out_specs=pl.BlockSpec((bm, Vp), lambda i, k: (i, 0)),
        scratch_shapes=[pltpu.VMEM((bm, H), jnp.float32)],      # dense acc
    )

    out = pl.pallas_call(
        _lmhead_kernel,
        out_shape=jax.ShapeDtypeStruct((M, Vp), jnp.float32),
        grid_spec=grid_spec,
        compiler_params=pltpu.CompilerParams(
            dimension_semantics=("parallel", "arbitrary"),
            vmem_limit_bytes=vmem_limit),
        cost_estimate=cost,
    )(x, wd_t, bd, lnw, lnb, wdec_t, bias)

    # Padded tail rows (if M % bm != 0) and padded vocab lanes are garbage by
    # construction and sliced off here; never read logits[M:] / [..., V:].
    return out[:, :V].reshape(B, S, V)


def _reference(features, params):
    """Pure-JAX f32 reference matching the PyTorch forward."""
    x = features @ params["dense_w"].T + params["dense_b"]
    x = x * 0.5 * (1.0 + lax.erf(x / math.sqrt(2.0)))
    mean = jnp.mean(x, axis=-1, keepdims=True)
    var = jnp.mean((x - mean) ** 2, axis=-1, keepdims=True)
    x = (x - mean) / jnp.sqrt(var + 1e-5)
    x = x * params["ln_w"] + params["ln_b"]
    return x @ params["decoder_w"].T + params["bias"]


def init_params(key, hidden_size, vocab_size=33):
    k1, k2, k3, k4 = jax.random.split(key, 4)
    scale = 1.0 / math.sqrt(hidden_size)
    return {
        "dense_w": jax.random.uniform(k1, (hidden_size, hidden_size),
                                      jnp.float32, -scale, scale),
        "dense_b": jax.random.uniform(k2, (hidden_size,),
                                      jnp.float32, -scale, scale),
        "ln_w": jnp.ones((hidden_size,), jnp.float32),
        "ln_b": jnp.zeros((hidden_size,), jnp.float32),
        "decoder_w": jax.random.uniform(k3, (vocab_size, hidden_size),
                                        jnp.float32, -scale, scale),
        # The module initializes this parameter to zeros; use small random
        # values here so the `decoder(x) + bias` path is actually exercised.
        "bias": 0.01 * jax.random.normal(k4, (vocab_size,), jnp.float32),
    }


if __name__ == "__main__":
    B, S, H, V = 2, 8, 32, 33
    key = jax.random.PRNGKey(0)
    kx, kp = jax.random.split(key)
    features = jax.random.normal(kx, (B, S, H), jnp.float32)
    params = init_params(kp, H, V)

    out = lm_head(features, params)
    out = jax.block_until_ready(out)

    ref = _reference(features, params)
    assert out.shape == (B, S, V)
    # bf16 MXU inputs (f32 accumulation) vs. the pure-f32 reference -> looser
    # tolerance than a pure f32 kernel would need.
    err = float(jnp.max(jnp.abs(out - ref)))
    assert jnp.allclose(out, ref, atol=5e-2, rtol=5e-2), err

    print("KERNEL_OK")
</pallas_src>

<mosaic_0001>
module attributes {stable_mosaic.version = 11 : i64} {
  func.func @_lmhead_kernel(%arg0: i32, %arg1: i32, %arg2: memref<16x32xf32, #tpu.memory_space<vmem>>, %arg3: memref<32x32xbf16, #tpu.memory_space<vmem>>, %arg4: memref<1x32xf32, #tpu.memory_space<vmem>>, %arg5: memref<1x32xf32, #tpu.memory_space<vmem>>, %arg6: memref<1x32xf32, #tpu.memory_space<vmem>>, %arg7: memref<32x128xbf16, #tpu.memory_space<vmem>>, %arg8: memref<1x128xf32, #tpu.memory_space<vmem>>, %arg9: memref<16x128xf32, #tpu.memory_space<vmem>>, %arg10: memref<16x32xf32, #tpu.memory_space<vmem>>) attributes {dimension_semantics = [#tpu.dimension_semantics<parallel>, #tpu.dimension_semantics<arbitrary>], iteration_bounds = array<i64: 1, 1>, scalar_prefetch = 0 : i64, scratch_operands = 1 : i64, tpu.core_type = #tpu.core_type<tc>, window_params = [{transform_indices = @transform_0, window_bounds = array<i64: 16, 32>}, {transform_indices = @transform_1, window_bounds = array<i64: 32, 32>}, {pipeline_mode = #tpu.pipeline_mode<synchronous>, transform_indices = @transform_2, window_bounds = array<i64: 1, 32>}, {pipeline_mode = #tpu.pipeline_mode<synchronous>, transform_indices = @transform_3, window_bounds = array<i64: 1, 32>}, {pipeline_mode = #tpu.pipeline_mode<synchronous>, transform_indices = @transform_4, window_bounds = array<i64: 1, 32>}, {pipeline_mode = #tpu.pipeline_mode<synchronous>, transform_indices = @transform_5, window_bounds = array<i64: 32, 128>}, {pipeline_mode = #tpu.pipeline_mode<synchronous>, transform_indices = @transform_6, window_bounds = array<i64: 1, 128>}, {transform_indices = @transform_7, window_bounds = array<i64: 16, 128>}]} {
    %c0_i32 = arith.constant 0 : i32
    %0 = arith.cmpi eq, %arg1, %c0_i32 : i32
    %1 = arith.extui %0 : i1 to i32
    %c0_i32_0 = arith.constant 0 : i32
    %2 = arith.cmpi ne, %1, %c0_i32_0 : i32
    scf.if %2 {
      %cst_10 = arith.constant 0.000000e+00 : f32
      %13 = vector.broadcast %cst_10 : f32 to vector<16x32xf32>
      %c0_11 = arith.constant 0 : index
      %c0_12 = arith.constant 0 : index
      %14 = vector.load %arg10[%c0_11, %c0_12] : memref<16x32xf32, #tpu.memory_space<vmem>>, vector<16x32xf32>
      tpu.vector_store %arg10[%c0_11, %c0_12], %13 {strides = array<i32>} : memref<16x32xf32, #tpu.memory_space<vmem>>, vector<16x32xf32>,
    } else {
    }
    %c0 = arith.constant 0 : index
    %c0_1 = arith.constant 0 : index
    %3 = vector.load %arg10[%c0, %c0_1] : memref<16x32xf32, #tpu.memory_space<vmem>>, vector<16x32xf32>
    %c0_2 = arith.constant 0 : index
    %c0_3 = arith.constant 0 : index
    %4 = vector.load %arg2[%c0_2, %c0_3] : memref<16x32xf32, #tpu.memory_space<vmem>>, vector<16x32xf32>
    %5 = arith.truncf %4 : vector<16x32xf32> to vector<16x32xbf16>
    %c0_4 = arith.constant 0 : index
    %c0_5 = arith.constant 0 : index
    %6 = vector.load %arg3[%c0_4, %c0_5] : memref<32x32xbf16, #tpu.memory_space<vmem>>, vector<32x32xbf16>
    %cst = arith.constant dense<0.000000e+00> : vector<16x32xf32>
    %7 = tpu.matmul %5, %6, %cst {dimension_numbers = #tpu.dot_dimension_numbers<[1], [0], [0], [1], [0, 0, 1, 1], [], []>} : vector<16x32xbf16>, vector<32x32xbf16>, vector<16x32xf32> -> vector<16x32xf32>
    %8 = arith.addf %3, %7 : vector<16x32xf32>
    %c0_6 = arith.constant 0 : index
    %c0_7 = arith.constant 0 : index
    %9 = vector.load %arg10[%c0_6, %c0_7] : memref<16x32xf32, #tpu.memory_space<vmem>>, vector<16x32xf32>
    tpu.vector_store %arg10[%c0_6, %c0_7], %8 {strides = array<i32>} : memref<16x32xf32, #tpu.memory_space<vmem>>, vector<16x32xf32>,
    %c0_i32_8 = arith.constant 0 : i32
    %10 = arith.cmpi eq, %arg1, %c0_i32_8 : i32
    %11 = arith.extui %10 : i1 to i32
    %c0_i32_9 = arith.constant 0 : i32
    %12 = arith.cmpi ne, %11, %c0_i32_9 : i32
    scf.if %12 {
      %c0_10 = arith.constant 0 : index
      %c0_11 = arith.constant 0 : index
      %13 = vector.load %arg10[%c0_10, %c0_11] : memref<16x32xf32, #tpu.memory_space<vmem>>, vector<16x32xf32>
      %c0_12 = arith.constant 0 : index
      %c0_13 = arith.constant 0 : index
      %14 = vector.load %arg4[%c0_12, %c0_13] : memref<1x32xf32, #tpu.memory_space<vmem>>, vector<1x32xf32>
      %15 = vector.broadcast %14 : vector<1x32xf32> to vector<16x32xf32>
      %16 = arith.addf %13, %15 : vector<16x32xf32>
      %cst_14 = arith.constant 5.000000e-01 : f32
      %17 = vector.broadcast %cst_14 : f32 to vector<16x32xf32>
      %18 = arith.mulf %16, %17 : vector<16x32xf32>
      %cst_15 = arith.constant 0.707106769 : f32
      %19 = vector.broadcast %cst_15 : f32 to vector<16x32xf32>
      %20 = arith.mulf %16, %19 : vector<16x32xf32>
      %21 = math.erf %20 : vector<16x32xf32>
      %cst_16 = arith.constant 1.000000e+00 : f32
      %22 = vector.broadcast %cst_16 : f32 to vector<16x32xf32>
      %23 = arith.addf %22, %21 : vector<16x32xf32>
      %24 = arith.mulf %18, %23 : vector<16x32xf32>
      %cst_17 = arith.constant dense<0.000000e+00> : vector<16xf32>
      %25 = vector.multi_reduction <add>, %24, %cst_17 [1] : vector<16x32xf32> to vector<16xf32>
      %26 = vector.shape_cast %25 : vector<16xf32> to vector<16x1xf32>
      %cst_18 = arith.constant 3.200000e+01 : f32
      %27 = vector.broadcast %cst_18 : f32 to vector<16x1xf32>
      %28 = arith.divf %26, %27 : vector<16x1xf32>
      %29 = vector.broadcast %28 : vector<16x1xf32> to vector<16x32xf32>
      %30 = arith.subf %24, %29 : vector<16x32xf32>
      %31 = arith.mulf %30, %30 : vector<16x32xf32>
      %cst_19 = arith.constant dense<0.000000e+00> : vector<16xf32>
      %32 = vector.multi_reduction <add>, %31, %cst_19 [1] : vector<16x32xf32> to vector<16xf32>
      %33 = vector.shape_cast %32 : vector<16xf32> to vector<16x1xf32>
      %cst_20 = arith.constant 3.200000e+01 : f32
      %34 = vector.broadcast %cst_20 : f32 to vector<16x1xf32>
      %35 = arith.divf %33, %34 : vector<16x1xf32>
      %cst_21 = arith.constant 9.99999974E-6 : f32
      %36 = vector.broadcast %cst_21 : f32 to vector<16x1xf32>
      %37 = arith.addf %35, %36 : vector<16x1xf32>
      %38 = math.rsqrt %37 : vector<16x1xf32>
      %39 = vector.broadcast %38 : vector<16x1xf32> to vector<16x32xf32>
      %40 = arith.mulf %30, %39 : vector<16x32xf32>
      %c0_22 = arith.constant 0 : index
      %c0_23 = arith.constant 0 : index
      %41 = vector.load %arg5[%c0_22, %c0_23] : memref<1x32xf32, #tpu.memory_space<vmem>>, vector<1x32xf32>
      %42 = vector.broadcast %41 : vector<1x32xf32> to vector<16x32xf32>
      %43 = arith.mulf %40, %42 : vector<16x32xf32>
      %c0_24 = arith.constant 0 : index
      %c0_25 = arith.constant 0 : index
      %44 = vector.load %arg6[%c0_24, %c0_25] : memref<1x32xf32, #tpu.memory_space<vmem>>, vector<1x32xf32>
      %45 = vector.broadcast %44 : vector<1x32xf32> to vector<16x32xf32>
      %46 = arith.addf %43, %45 : vector<16x32xf32>
      %47 = arith.truncf %46 : vector<16x32xf32> to vector<16x32xbf16>
      %c0_26 = arith.constant 0 : index
      %c0_27 = arith.constant 0 : index
      %48 = vector.load %arg7[%c0_26, %c0_27] : memref<32x128xbf16, #tpu.memory_space<vmem>>, vector<32x128xbf16>
      %cst_28 = arith.constant dense<0.000000e+00> : vector<16x128xf32>
      %49 = tpu.matmul %47, %48, %cst_28 {dimension_numbers = #tpu.dot_dimension_numbers<[1], [0], [0], [1], [0, 0, 1, 1], [], []>} : vector<16x32xbf16>, vector<32x128xbf16>, vector<16x128xf32> -> vector<16x128xf32>
      %c0_29 = arith.constant 0 : index
      %c0_30 = arith.constant 0 : index
      %50 = vector.load %arg8[%c0_29, %c0_30] : memref<1x128xf32, #tpu.memory_space<vmem>>, vector<1x128xf32>
      %51 = vector.broadcast %50 : vector<1x128xf32> to vector<16x128xf32>
      %52 = arith.addf %49, %51 : vector<16x128xf32>
      %c0_31 = arith.constant 0 : index
      %c0_32 = arith.constant 0 : index
      %53 = vector.load %arg9[%c0_31, %c0_32] : memref<16x128xf32, #tpu.memory_space<vmem>>, vector<16x128xf32>
      tpu.vector_store %arg9[%c0_31, %c0_32], %52 {strides = array<i32>} : memref<16x128xf32, #tpu.memory_space<vmem>>, vector<16x128xf32>,
    } else {
    }
    return
  }
  func.func @transform_0(%arg0: i32, %arg1: i32) -> (i32, i32) {
    %c0_i32 = arith.constant 0 : i32
    return %arg0, %arg1 : i32, i32
  }
  func.func @transform_1(%arg0: i32, %arg1: i32) -> (i32, i32) {
    %c0_i32 = arith.constant 0 : i32
    %c0_i32_0 = arith.constant 0 : i32
    return %arg1, %c0_i32 : i32, i32
  }
  func.func @transform_2(%arg0: i32, %arg1: i32) -> (i32, i32) {
    %c0_i32 = arith.constant 0 : i32
    %c0_i32_0 = arith.constant 0 : i32
    %c0_i32_1 = arith.constant 0 : i32
    return %c0_i32, %c0_i32_0 : i32, i32
  }
  func.func @transform_3(%arg0: i32, %arg1: i32) -> (i32, i32) {
    %c0_i32 = arith.constant 0 : i32
    %c0_i32_0 = arith.constant 0 : i32
    %c0_i32_1 = arith.constant 0 : i32
    return %c0_i32, %c0_i32_0 : i32, i32
  }
  func.func @transform_4(%arg0: i32, %arg1: i32) -> (i32, i32) {
    %c0_i32 = arith.constant 0 : i32
    %c0_i32_0 = arith.constant 0 : i32
    %c0_i32_1 = arith.constant 0 : i32
    return %c0_i32, %c0_i32_0 : i32, i32
  }
  func.func @transform_5(%arg0: i32, %arg1: i32) -> (i32, i32) {
    %c0_i32 = arith.constant 0 : i32
    %c0_i32_0 = arith.constant 0 : i32
    %c0_i32_1 = arith.constant 0 : i32
    return %c0_i32, %c0_i32_0 : i32, i32
  }
  func.func @transform_6(%arg0: i32, %arg1: i32) -> (i32, i32) {
    %c0_i32 = arith.constant 0 : i32
    %c0_i32_0 = arith.constant 0 : i32
    %c0_i32_1 = arith.constant 0 : i32
    return %c0_i32, %c0_i32_0 : i32, i32
  }
  func.func @transform_7(%arg0: i32, %arg1: i32) -> (i32, i32) {
    %c0_i32 = arith.constant 0 : i32
    %c0_i32_0 = arith.constant 0 : i32
    return %arg0, %c0_i32 : i32, i32
  }
}

</mosaic_0001>

<bundles_post_ra>
// kernel: tpu_custom_call.1
= control target key start
LH: loop header
LB: loop body
LE: loop exit
PB: predicated region body
PF: predicated region fallthrough
CT: control target
= control target key end

     0   :  { %12 = vsyncpa [#allocation4], 0  ;;  %s600_s0 = inlined_call_operand.hbm [shape: f32[16,32], index: 0, kind: input, shape index: {}]   ;;  %s601_s1 = inlined_call_operand.hbm [shape: bf16[32,32], index: 1, kind: input, shape index: {}]   ;;  %s602_s2 = inlined_call_operand.vmem [shape: f32[1,32], index: 2, kind: input, shape index: {}]   ;;  %s603_s3 = inlined_call_operand.vmem [shape: f32[1,32], index: 3, kind: input, shape index: {}]   ;;  %s604_s4 = inlined_call_operand.vmem [shape: f32[1,32], index: 4, kind: input, shape index: {}]   ;;  %s605_s5 = inlined_call_operand.hbm [shape: bf16[32,128], index: 5, kind: input, shape index: {}]   ;;  %s606_s6 = inlined_call_operand.vmem [shape: f32[1,128], index: 6, kind: input, shape index: {}]   ;;  %s607_s7 = inlined_call_operand.hbm [shape: f32[16,128], index: 7, kind: output, shape index: {}]  }
   0x1   :  { %13 = vsyncpa [#allocation7], 0  ;;  %s32_s26 = sshll.u32 %s601_s1, 4  ;;  %s33_s26 = int_to_ptr.hbm [resolvable:$true] %s32_s26 }
   0x2   :  { %14 = vsyncpa [#allocation5], 0  ;;  %s497_s27 = smov [#allocation6]   ;;  %s19_s8 = sshll.u32 %s600_s0, 4  ;;  %s20_s8 = int_to_ptr.hbm [resolvable:$true] %s19_s8 }
   0x3   :  { %s34_s28 = sshll.u32 %s497_s27, 4  ;;  %s498_s9 = smov 64   ;;  %s35_s28 = int_to_ptr.vmem [resolvable:$true] %s34_s28 }
   0x4   :  { %s499_s10 = smov 4   ;;  %s500_s11 = smov [#allocation3]  }
   0x5   :  { %40 = dma.hbm_to_vmem [thread:$0]  %s33_s26, 256, %s35_s28, [#allocation7], %s498_s9, %s498_s9, %s499_s10  }
   0x6   :  { %s21_s12 = sshll.u32 %s500_s11, 4  ;;  %s501_s13 = smov 128   ;;  %s22_s12 = int_to_ptr.vmem [resolvable:$true] %s21_s12 }
   0x7   :  { %s502_s14 = smov 8   ;;  %s51_s16 = sshll.u32 %s605_s5, 4  ;;  %s52_s16 = int_to_ptr.hbm [resolvable:$true] %s51_s16 }
   0x8   :  { %27 = dma.hbm_to_vmem [thread:$0]  %s20_s8, 256, %s22_s12, [#allocation4], %s501_s13, %s501_s13, %s502_s14  }
   0x9   :  { %s503_s17 = smov [#allocation8]  }
   0xa   :  { %s53_s0 = sshll.u32 %s503_s17, 4  ;;  %s54_s0 = int_to_ptr.vmem [resolvable:$true] %s53_s0 }
   0xb   :  { %59 = dma.hbm_to_vmem [thread:$0]  %s52_s16, 256, %s54_s0, [#allocation7], %s498_s9, %s498_s9, %s499_s10  }
   0xc   :  { %491 = dma.done.wait [#allocation4], 256  }
   0xd   :  { %492 = vsyncadd [#allocation4], 4294967040 }
   0xe   :  { %493 = dma.done.wait [#allocation7], 512  }
   0xf   :  { %494 = vsyncadd [#allocation7], 4294966784  ;;  %vm79_vm0 = vcmask 261120   ;;  %v504_v0 = vmov 0.0   ;;  %v368_v1 = vld [vmem:[#allocation6 + $0x8] sm:$0xff]  ;;  %v367_v2 = vld [vmem:[#allocation6] sm:$0xff] }
  0x10   :  { %80 = vst.msk [vmem:[#allocation2] sm:$0xff] %vm79_vm0, %v504_v0  ;;  %v84_v3 = vld [vmem:[#allocation3] sm:$0xff]  ;;  %v85_v4 = vld [vmem:[#allocation3 + $0x8] sm:$0xff]  ;;  %113 = vmatpush.bf16.msra.mxu0 %v368_v1  ;;  %v381_v10 = vld [vmem:[%s602_s2] ss:$0 sm:$0xff]  ;;  %s333_s27 = sshll.u32 %s607_s7, 4  ;;  %s334_s27 = int_to_ptr.hbm [resolvable:$true] %s333_s27 }
  0x11   :  { %81 = vst.msk [vmem:[#allocation2 + $0x8] sm:$0xff] %vm79_vm0, %v504_v0  ;;  %v86_v5 = vpack.c.bf16 %v85_v4, %v84_v3 }
  0x14   :  { %114 = vmatpush.bf16.msra.mxu0 %v367_v2 }
  0x17   :  { %355 = vmatmul.msk.bf16.vlgmr.msra.gmra.mxu0 %vm79_vm0, %v86_v5  ;;  %v82_v6 = vld [vmem:[#allocation2] sm:$0xff] }
  0x18   :  { %v83_v9 = vld [vmem:[#allocation2 + $0x8] sm:$0xff] }
  0x94   :  { %v116_v7 = vpop.f32.mrf.mxu0 }
  0x95   :  { %v121_v8 = vadd.f32 %v116_v7, %v82_v6 }
  0x97   :  { %123 = vst.msk [vmem:[#allocation2] sm:$0xff] %vm79_vm0, %v121_v8 }
  0x9c   :  { %v118_v11 = vpop.f32.mrf.mxu0 }
  0x9d   :  { %v122_v12 = vadd.f32 %v118_v11, %v83_v9 }
  0x9e   :  { %v128_v13 = vld [vmem:[#allocation2] sm:$0xff] }
  0x9f   :  { %124 = vst.msk [vmem:[#allocation2 + $0x8] sm:$0xff] %vm79_vm0, %v122_v12  ;;  %v567_v14 = vadd.f32 %v381_v10, %v128_v13 }
  0xa1   :  { %v138_v15 = vmul.f32 0.70710677, %v567_v14 }
  0xa3   :  { %v140_v16 = vmul.f32 %v138_v15, %v138_v15 }
  0xa5   :  { %v141_v17 = vmin.f32 %v140_v16, 16.0 }
  0xa6   :  { %v129_v18 = vld [vmem:[#allocation2 + $0x8] sm:$0xff] }
  0xa7   :  { %v142_v19 = vmul.f32 2.1237322e-06, %v141_v17  ;;  %v153_v20 = vmul.f32 3.8918573e-05, %v141_v17  ;;  %v570_v21 = vadd.f32 %v381_v10, %v129_v18 }
  0xa9   :  { %v143_v22 = vadd.f32 0.00028619796, %v142_v19  ;;  %v154_v23 = vadd.f32 0.001143296, %v153_v20  ;;  %v573_v24 = vmul.f32 0.70710677, %v570_v21 }
  0xaa   :  { %v136_v20 = vmul.f32 0.5, %v567_v14 }
  0xab   :  { %v144_v25 = vmul.f32 %v143_v22, %v141_v17  ;;  %v155_v26 = vmul.f32 %v154_v23, %v141_v17  ;;  %v180_v27 = vmul.f32 %v573_v24, %v573_v24 }
  0xad   :  { %v156_v28 = vadd.f32 0.014752088, %v155_v26  ;;  %v145_v29 = vadd.f32 0.0036580483, %v144_v25  ;;  %v181_v30 = vmin.f32 %v180_v27, 16.0 }
  0xaf   :  { %v157_v31 = vmul.f32 %v156_v28, %v141_v17  ;;  %v182_v32 = vmul.f32 2.1237322e-06, %v181_v30  ;;  %v193_v33 = vmul.f32 3.8918573e-05, %v181_v30  ;;  %v146_v35 = vmul.f32 %v145_v29, %v141_v17 }
  0xb1   :  { %v158_v34 = vadd.f32 0.112945676, %v157_v31  ;;  %v183_v36 = vadd.f32 0.00028619796, %v182_v32  ;;  %v194_v37 = vadd.f32 0.001143296, %v193_v33 }
  0xb2   :  { %v147_v42 = vadd.f32 0.05243302, %v146_v35  ;;  %v137_v32 = vmul.f32 0.5, %v570_v21  ;;  %v505_v35 = vmov 32.0  }
  0xb3   :  { %v159_v38 = vmul.f32 %v158_v34, %v141_v17  ;;  %v184_v39 = vmul.f32 %v183_v36, %v181_v30  ;;  %v195_v40 = vmul.f32 %v194_v37, %v181_v30 }
  0xb4   :  { %v148_v48 = vmul.f32 %v147_v42, %v141_v17 }
  0xb5   :  { %v160_v41 = vadd.f32 0.4994258, %v159_v38  ;;  %v196_v43 = vadd.f32 0.014752088, %v195_v40  ;;  %v185_v45 = vadd.f32 0.0036580483, %v184_v39 }
  0xb6   :  { %v149_v52 = vadd.f32 0.18741608, %v148_v48 }
  0xb7   :  { %v161_v44 = vmul.f32 %v160_v41, %v141_v17  ;;  %v197_v46 = vmul.f32 %v196_v43, %v181_v30  ;;  %v186_v50 = vmul.f32 %v185_v45, %v181_v30 }
  0xb8   :  { %v150_v57 = vmul.f32 %v149_v52, %v141_v17 }
  0xb9   :  { %v162_v47 = vadd.f32 1.0, %v161_v44  ;;  %v198_v49 = vadd.f32 0.112945676, %v197_v46  ;;  %v187_v54 = vadd.f32 0.05243302, %v186_v50 }
  0xba   :  { %v151_v63 = vadd.f32 1.1283791, %v150_v57 }
  0xbb   :  { %385 = vrcp.f32 %v162_v47  ;;  %v199_v51 = vmul.f32 %v198_v49, %v181_v30  ;;  %v188_v60 = vmul.f32 %v187_v54, %v181_v30  ;;  %v174_v62 = vand.u32 2147483648, %v162_v47 }
  0xbc   :  { %v172_v1 = vand.u32 2147483647, %v162_v47  ;;  %vm168_vm2 = vweird.f32 %v162_v47  ;;  %v152_v6 = vmul.f32 %v151_v63, %v138_v15 }
  0xbd   :  { %v200_v53 = vadd.f32 0.4994258, %v199_v51  ;;  %v189_v2 = vadd.f32 0.18741608, %v188_v60  ;;  %v175_v4 = vor.u32 1.1754944e-38, %v174_v62  ;;  %v370_v51 = vld [vmem:[#allocation8 + $0x8] sm:$0xff] }
  0xbe   :  { %vm173_vm4 = vcmp.eq.f32.partialorder %v172_v1, 8.507059e+37  ;;  %317 = vmatpush.bf16.msra.mxu1 %v370_v51 }
  0xbf   :  { %v201_v55 = vmul.f32 %v200_v53, %v181_v30  ;;  %v190_v9 = vmul.f32 %v189_v2, %v181_v30  ;;  %v369_v53 = vld [vmem:[#allocation8] sm:$0xff] }
  0xc1   :  { %v386_v56 = vpop.eup %385  ;;  %v202_v59 = vadd.f32 1.0, %v201_v55  ;;  %v191_v17 = vadd.f32 1.1283791, %v190_v9 }
  0xc2   :  { %v164_v58 = vmul.f32 %v386_v56, %v162_v47  ;;  %vm169_vm1 = vweird.f32 %v386_v56  ;;  %318 = vmatpush.bf16.msra.mxu1 %v369_v53 }
  0xc3   :  { %387 = vrcp.f32 %v202_v59  ;;  %vm170_vm3 = vmor %vm168_vm2, %vm169_vm1  ;;  %v214_v16 = vand.u32 2147483648, %v202_v59  ;;  %v212_v19 = vand.u32 2147483647, %v202_v59  ;;  %vm208_vm6 = vweird.f32 %v202_v59 }
  0xc4   :  { %v165_v61 = vsub.f32 1.0, %v164_v58  ;;  %v192_v26 = vmul.f32 %v191_v17, %v573_v24  ;;  %389 = vrcp.f32 %v505_v35 }
  0xc5   :  { %v215_v15 = vor.u32 1.1754944e-38, %v214_v16  ;;  %vm213_vm8 = vcmp.eq.f32.partialorder %v212_v19, 8.507059e+37  ;;  %v384_v19 = vld [vmem:[%s606_s6] ss:$0 sm:$0xff] }
  0xc6   :  { %v166_v0 = vmul.f32 %v386_v56, %v165_v61 }
  0xc8   :  { %v167_v3 = vadd.f32 %v386_v56, %v166_v0 }
  0xc9   :  { %v388_v5 = vpop.eup %387 }
  0xca   :  { %v171_v7 = vsel %vm170_vm3, %v386_v56, %v167_v3  ;;  %v204_v10 = vmul.f32 %v388_v5, %v202_v59  ;;  %vm209_vm5 = vweird.f32 %v388_v5  ;;  %v390_v36 = vpop.eup %389 }
  0xcb   :  { %v176_v8 = vsel %vm173_vm4, %v175_v4, %v171_v7  ;;  %vm210_vm7 = vmor %vm208_vm6, %vm209_vm5  ;;  %v231_v37 = vmul.f32 32.0, %v390_v36  ;;  %vm235_vm9 = vweird.f32 %v390_v36  ;;  %v382_v7 = vld [vmem:[%s603_s3] ss:$0 sm:$0xff]  ;;  %s506_s3 = smov [#allocation9]  }
  0xcc   :  { %v177_v11 = vmul.f32 %v176_v8, %v152_v6  ;;  %v205_v12 = vsub.f32 1.0, %v204_v10  ;;  %s331_s24 = sshll.u32 %s506_s3, 4  ;;  %s332_s24 = int_to_ptr.vmem [resolvable:$true] %s331_s24 }
  0xcd   :  { %v232_v24 = vsub.f32 1.0, %v231_v37 }
  0xce   :  { %v356_v13 = vclamps-f32 %v177_v11, 1.0  ;;  %v206_v18 = vmul.f32 %v388_v5, %v205_v12  ;;  %v383_v12 = vld [vmem:[%s604_s4] ss:$0 sm:$0xff] }
  0xcf   :  { %v233_v38 = vmul.f32 %v390_v36, %v232_v24 }
  0xd0   :  { %v220_v22 = vadd.f32 1.0, %v356_v13  ;;  %v207_v23 = vadd.f32 %v388_v5, %v206_v18 }
  0xd1   :  { %v234_v39 = vadd.f32 %v390_v36, %v233_v38 }
  0xd2   :  { %v222_v25 = vmul.f32 %v220_v22, %v136_v20  ;;  %v211_v27 = vsel %vm210_vm7, %v388_v5, %v207_v23 }
  0xd3   :  { %v216_v29 = vsel %vm213_vm8, %v215_v15, %v211_v27  ;;  %v236_v40 = vsel %vm235_vm9, %v390_v36, %v234_v39 }
  0xd4   :  { %v224_v28 = vsel %vm79_vm0, %v222_v25, 0.0  ;;  %v217_v30 = vmul.f32 %v216_v29, %v192_v26 }
  0xd5   :  { %225 = vadd.xlane.f32.xlu0 %v224_v28 }
  0xd6   :  { %v357_v31 = vclamps-f32 %v217_v30, 1.0 }
  0xd8   :  { %v221_v33 = vadd.f32 1.0, %v357_v31 }
  0xda   :  { %v223_v14 = vmul.f32 %v221_v33, %v137_v32 }
  0xdc   :  { %v227_v34 = vsel %vm79_vm0, %v223_v14, 0.0 }
  0xdd   :  { %228 = vadd.xlane.f32.xlu0 %v227_v34 }
 0x148   :  { %v226_v41 = vpop.xlane.xlu0 %225 }
 0x149   :  { %v237_v42 = vmul.f32 %v236_v40, %v226_v41 }
 0x14b   :  { %v239_v43 = vsub.f32 %v222_v25, %v237_v42 }
 0x14d   :  { %v241_v44 = vmul.f32 %v239_v43, %v239_v43 }
 0x14f   :  { %v243_v21 = vsel %vm79_vm0, %v241_v44, 0.0 }
 0x150   :  { %244 = vadd.xlane.f32.xlu1 %v243_v21  ;;  %v229_v45 = vpop.xlane.xlu0 %228 }
 0x151   :  { %v238_v46 = vmul.f32 %v236_v40, %v229_v45 }
 0x153   :  { %v240_v47 = vsub.f32 %v223_v14, %v238_v46 }
 0x155   :  { %v242_v48 = vmul.f32 %v240_v47, %v240_v47 }
 0x157   :  { %v246_v49 = vsel %vm79_vm0, %v242_v48, 0.0 }
 0x158   :  { %247 = vadd.xlane.f32.xlu1 %v246_v49 }
 0x1c3   :  { %v245_v50 = vpop.xlane.xlu1 %244 }
 0x1c4   :  { %v249_v52 = vmul.f32 %v245_v50, %v236_v40 }
 0x1c6   :  { %v251_v54 = vadd.f32 1e-05, %v249_v52 }
 0x1c8   :  { %391 = vrsqrt.f32 %v251_v54  ;;  %vm259_vm11 = vweird.f32 %v251_v54 }
 0x1cb   :  { %v248_v55 = vpop.xlane.xlu1 %247 }
 0x1cc   :  { %v250_v56 = vmul.f32 %v248_v55, %v236_v40 }
 0x1ce   :  { %v392_v57 = vpop.eup %391  ;;  %v252_v59 = vadd.f32 1e-05, %v250_v56 }
 0x1cf   :  { %v254_v58 = vmul.f32 %v392_v57, %v251_v54  ;;  %vm260_vm10 = vweird.f32 %v392_v57 }
 0x1d0   :  { %393 = vrsqrt.f32 %v252_v59  ;;  %vm261_vm12 = vmor %vm259_vm11, %vm260_vm10  ;;  %vm269_vm14 = vweird.f32 %v252_v59 }
 0x1d1   :  { %v255_v60 = vmul.f32 %v392_v57, %v254_v58 }
 0x1d3   :  { %v256_v61 = vmul.f32 0.5, %v255_v60 }
 0x1d5   :  { %v257_v62 = vsub.f32 1.5, %v256_v61 }
 0x1d6   :  { %v394_v63 = vpop.eup %393 }
 0x1d7   :  { %v258_v0 = vmul.f32 %v392_v57, %v257_v62  ;;  %v264_v1 = vmul.f32 %v394_v63, %v252_v59  ;;  %vm270_vm13 = vweird.f32 %v394_v63 }
 0x1d8   :  { %vm271_vm15 = vmor %vm269_vm14, %vm270_vm13 }
 0x1d9   :  { %v265_v2 = vmul.f32 %v394_v63, %v264_v1  ;;  %v262_v3 = vsel %vm261_vm12, %v392_v57, %v258_v0 }
 0x1da   :  { %v273_v6 = vmul.f32 %v262_v3, %v239_v43 }
 0x1db   :  { %v266_v4 = vmul.f32 0.5, %v265_v2 }
 0x1dc   :  { %v279_v11 = vmul.f32 %v382_v7, %v273_v6 }
 0x1dd   :  { %v267_v5 = vsub.f32 1.5, %v266_v4 }
 0x1de   :  { %v285_v16 = vadd.f32 %v383_v12, %v279_v11 }
 0x1df   :  { %v268_v8 = vmul.f32 %v394_v63, %v267_v5 }
 0x1e1   :  { %v272_v9 = vsel %vm271_vm15, %v394_v63, %v268_v8 }
 0x1e2   :  { %v274_v10 = vmul.f32 %v272_v9, %v240_v47 }
 0x1e4   :  { %v280_v13 = vmul.f32 %v382_v7, %v274_v10 }
 0x1e6   :  { %v286_v17 = vadd.f32 %v383_v12, %v280_v13 }
 0x1e8   :  { %v287_v18 = vpack.c.bf16 %v286_v17, %v285_v16 }
 0x1ea   :  { %366 = vmatmul.msk.bf16.vlgmr.msra.gmra.mxu1 %vm79_vm0, %v287_v18 }
 0x267   :  { %v320_v20 = vpop.f32.mrf.mxu1 }
 0x268   :  { %v321_v22 = vadd.f32 %v384_v19, %v320_v20 }
 0x26a   :  { %325 = vst [vmem:[#allocation9] sm:$0xff] %v321_v22 }
 0x26f   :  { %v322_v23 = vpop.f32.mrf.mxu1 }
 0x270   :  { %v323_v25 = vadd.f32 %v384_v19, %v322_v23 }
 0x272   :  { %326 = vst [vmem:[#allocation9 + $0x8] sm:$0xff] %v323_v25 }
 0x273   :  { %339 = dma.vmem_to_hbm [thread:$0]  %s332_s24, 256, %s334_s27, [#allocation5], %s501_s13, %s501_s13, %s502_s14  }
 0x274   :  { %495 = dma.done.wait [#allocation5], 256  }
 0x275   :  { %496 = vsyncadd [#allocation5], 4294967040 }
 0x276   :  { %344 = vsyncpa [#allocation4], 1 }
 0x277   :  { %345 = vsyncpa [#allocation7], 1 }
 0x278   :  { %346 = vsyncpa [#allocation5], 1 }

</bundles_post_ra>
